<compile_context>
chip_gen: v7x
topology: tpu7x:2x2x1
jax: 0.10.0
libtpu: 0.0.40
codegen_flags: <defaults>
</compile_context>

<pallas_src>
import functools

import jax
import jax.numpy as jnp
from jax.experimental import pallas as pl
from jax.experimental.pallas import tpu as pltpu

_LANES = 128


def _cox_ph_kernel(logh_ref, ew_ref, out_ref,
                   carry_ref, num_ref, den_ref, tri_lane_ref, tri_row_ref,
                   *, eps):
    step = pl.program_id(0)
    r, lanes = logh_ref.shape

    @pl.when(step == 0)
    def _init():
        carry_ref[...] = jnp.zeros_like(carry_ref)
        num_ref[...] = jnp.zeros_like(num_ref)
        den_ref[...] = jnp.zeros_like(den_ref)
        # Triangular constants built once (not per grid step).
        li = jax.lax.broadcasted_iota(jnp.int32, (lanes, lanes), 0)
        lj = jax.lax.broadcasted_iota(jnp.int32, (lanes, lanes), 1)
        tri_lane_ref[...] = (li <= lj).astype(jnp.float32)   # inclusive prefix
        ri = jax.lax.broadcasted_iota(jnp.int32, (r, r), 0)
        rj = jax.lax.broadcasted_iota(jnp.int32, (r, r), 1)
        tri_row_ref[...] = (rj < ri).astype(jnp.float32)     # exclusive prefix

    x = logh_ref[...].astype(jnp.float32)       # (R, 128) sorted log-hazards
    ew = ew_ref[...].astype(jnp.float32)        # (R, 128) events * weights

    ex = jnp.exp(x)
    # Prefix sum along lanes (128 consecutive samples per row) on the MXU.
    cum_lane = jnp.dot(ex, tri_lane_ref[...],
                       preferred_element_type=jnp.float32)          # (R, 128)
    # Exclusive prefix of per-row totals, broadcast across lanes.
    row_sum = jnp.sum(ex, axis=-1, keepdims=True)                    # (R, 1)
    row_sum_b = jnp.broadcast_to(row_sum, (r, lanes))                # (R, 128)
    row_prefix = jnp.dot(tri_row_ref[...], row_sum_b,
                         preferred_element_type=jnp.float32)         # (R, 128)
    # Running cumulative sum of exp(log_h) over the whole sorted sequence.
    cum = cum_lane + row_prefix + carry_ref[...]
    log_cum = jnp.log(cum + eps)

    ll = (x - log_cum) * ew                      # weighted log-likelihood terms
    num_ref[...] += jnp.sum(ll, keepdims=True)
    den_ref[...] += jnp.sum(ew, keepdims=True)
    carry_ref[...] += jnp.sum(ex, keepdims=True)

    @pl.when(step == pl.num_programs(0) - 1)
    def _finalize():
        out_ref[...] = -num_ref[...] / (den_ref[...] + eps)


def cox_ph_loss(preds, targets, *, event_weight=1.0, censored_weight=1.0,
                eps=1e-7):
    """JAX/Pallas equivalent of pathbench CoxPHLoss.forward.

    preds:   (N,) predicted log hazard ratios
    targets: (N, 2) -> [:, 0] durations, [:, 1] event indicators (1/0)
    """
    preds = jnp.asarray(preds)
    targets = jnp.asarray(targets)

    durations = targets[:, 0].reshape(-1).astype(jnp.float32)
    events = targets[:, 1].reshape(-1).astype(jnp.float32)
    log_h = preds.reshape(-1).astype(jnp.float32)
    n = log_h.shape[0]

    weights = jnp.where(events == 1, jnp.float32(event_weight),
                        jnp.float32(censored_weight))

    # TODO(synk): argsort has no clean Pallas TPU equivalent; the sort (and
    # gather) runs as plain JAX/XLA on device before the kernel.
    order = jnp.argsort(-durations)              # descending by duration
    log_h_s = log_h[order]
    ew_s = (events * weights)[order]             # fused events*weights

    # Lane-dense layout: pad to a multiple of tile_r*128 and reshape so the
    # sorted sequence runs row-major over a (rows, 128) array.
    rows = pl.cdiv(n, _LANES)
    tile_r = min(256, ((rows + 7) // 8) * 8)     # rows per grid step (mult. of 8)
    rows_pad = pl.cdiv(rows, tile_r) * tile_r
    n_pad = rows_pad * _LANES
    pad = n_pad - n
    # Padding: ew=0 -> no contribution; padded log_h only affects cum at padded
    # positions (they come after all valid samples), which are masked by ew=0.
    log_h_p = jnp.pad(log_h_s, (0, pad)).reshape(rows_pad, _LANES)
    ew_p = jnp.pad(ew_s, (0, pad)).reshape(rows_pad, _LANES)

    grid = (rows_pad // tile_r,)
    kernel = functools.partial(_cox_ph_kernel, eps=float(eps))

    out = pl.pallas_call(
        kernel,
        out_shape=jax.ShapeDtypeStruct((1, 1), jnp.float32),
        grid_spec=pltpu.PrefetchScalarGridSpec(
            num_scalar_prefetch=0,
            grid=grid,
            in_specs=[
                pl.BlockSpec((tile_r, _LANES), lambda i: (i, 0)),
                pl.BlockSpec((tile_r, _LANES), lambda i: (i, 0)),
            ],
            out_specs=pl.BlockSpec((1, 1), lambda i: (0, 0)),
            scratch_shapes=[
                pltpu.VMEM((1, 1), jnp.float32),          # carry (running cumsum)
                pltpu.VMEM((1, 1), jnp.float32),          # numerator accumulator
                pltpu.VMEM((1, 1), jnp.float32),          # denominator accumulator
                pltpu.VMEM((_LANES, _LANES), jnp.float32),  # lane prefix matrix
                pltpu.VMEM((tile_r, tile_r), jnp.float32),  # row prefix matrix
            ],
        ),
        compiler_params=pltpu.CompilerParams(
            # The cumulative sum carry is inherently sequential over rows.
            dimension_semantics=("arbitrary",),
            vmem_limit_bytes=32 * 1024 * 1024,
        ),
    )(log_h_p, ew_p)

    loss = out[0, 0]
    # torch: if torch.sum(events) == 0: return 1e-6
    return jnp.where(jnp.sum(events) == 0,
                     jnp.asarray(1e-6, jnp.float32), loss)


def _cox_ph_loss_ref(preds, targets, *, event_weight=1.0, censored_weight=1.0,
                     eps=1e-7):
    """Pure-JAX reference mirroring the PyTorch implementation."""
    durations = targets[:, 0].reshape(-1).astype(jnp.float32)
    events = targets[:, 1].reshape(-1).astype(jnp.float32)
    log_h = preds.reshape(-1).astype(jnp.float32)
    weights = jnp.where(events == 1, jnp.float32(event_weight),
                        jnp.float32(censored_weight))
    order = jnp.argsort(-durations)
    log_h = log_h[order]
    events_s = events[order]
    w_s = weights[order]
    exp_log_h = jnp.exp(log_h)
    cum = jnp.cumsum(exp_log_h)
    log_cum = jnp.log(cum + eps)
    ll = (log_h - log_cum) * events_s * w_s
    loss = -jnp.sum(ll) / (jnp.sum(events_s * w_s) + eps)
    return jnp.where(jnp.sum(events) == 0, jnp.float32(1e-6), loss)


if __name__ == "__main__":
    key = jax.random.PRNGKey(0)
    k1, k2, k3 = jax.random.split(key, 3)

    N = 64
    preds = jax.random.normal(k1, (N,), jnp.float32)              # log hazards
    durations = jax.random.uniform(k2, (N,), jnp.float32, 0.1, 10.0)
    events = (jax.random.uniform(k3, (N,)) < 0.6).astype(jnp.float32)
    targets = jnp.stack([durations, events], axis=1)              # (N, 2)

    out = cox_ph_loss(preds, targets, event_weight=1.5, censored_weight=0.5)
    out = jax.block_until_ready(out)

    ref = _cox_ph_loss_ref(preds, targets, event_weight=1.5, censored_weight=0.5)
    assert jnp.allclose(out, ref, rtol=1e-5, atol=1e-6), (out, ref)

    print("KERNEL_OK")
</pallas_src>

<mosaic_0001>
module attributes {stable_mosaic.version = 11 : i64} {
  func.func @_cox_ph_kernel(%arg0: i32, %arg1: memref<8x128xf32, #tpu.memory_space<vmem>>, %arg2: memref<8x128xf32, #tpu.memory_space<vmem>>, %arg3: memref<1x1xf32, #tpu.memory_space<vmem>>, %arg4: memref<1x1xf32, #tpu.memory_space<vmem>>, %arg5: memref<1x1xf32, #tpu.memory_space<vmem>>, %arg6: memref<1x1xf32, #tpu.memory_space<vmem>>, %arg7: memref<128x128xf32, #tpu.memory_space<vmem>>, %arg8: memref<8x8xf32, #tpu.memory_space<vmem>>) attributes {dimension_semantics = [#tpu.dimension_semantics<arbitrary>], iteration_bounds = array<i64: 1>, scalar_prefetch = 0 : i64, scratch_operands = 5 : i64, tpu.core_type = #tpu.core_type<tc>, window_params = [{transform_indices = @transform_0, window_bounds = array<i64: 8, 128>}, {transform_indices = @transform_1, window_bounds = array<i64: 8, 128>}, {pipeline_mode = #tpu.pipeline_mode<synchronous>, transform_indices = @transform_2, window_bounds = array<i64: 1, 1>}]} {
    %c0_i32 = arith.constant 0 : i32
    %0 = arith.cmpi eq, %arg0, %c0_i32 : i32
    %1 = arith.extui %0 : i1 to i32
    %c0_i32_0 = arith.constant 0 : i32
    %2 = arith.cmpi ne, %1, %c0_i32_0 : i32
    scf.if %2 {
      %cst_30 = arith.constant 0.000000e+00 : f32
      %50 = vector.broadcast %cst_30 : f32 to vector<1x1xf32>
      %c0_31 = arith.constant 0 : index
      %c0_32 = arith.constant 0 : index
      %51 = vector.load %arg4[%c0_31, %c0_32] : memref<1x1xf32, #tpu.memory_space<vmem>>, vector<1x1xf32>
      tpu.vector_store %arg4[%c0_31, %c0_32], %50 {strides = array<i32>} : memref<1x1xf32, #tpu.memory_space<vmem>>, vector<1x1xf32>,
      %cst_33 = arith.constant 0.000000e+00 : f32
      %52 = vector.broadcast %cst_33 : f32 to vector<1x1xf32>
      %c0_34 = arith.constant 0 : index
      %c0_35 = arith.constant 0 : index
      %53 = vector.load %arg5[%c0_34, %c0_35] : memref<1x1xf32, #tpu.memory_space<vmem>>, vector<1x1xf32>
      tpu.vector_store %arg5[%c0_34, %c0_35], %52 {strides = array<i32>} : memref<1x1xf32, #tpu.memory_space<vmem>>, vector<1x1xf32>,
      %cst_36 = arith.constant 0.000000e+00 : f32
      %54 = vector.broadcast %cst_36 : f32 to vector<1x1xf32>
      %c0_37 = arith.constant 0 : index
      %c0_38 = arith.constant 0 : index
      %55 = vector.load %arg6[%c0_37, %c0_38] : memref<1x1xf32, #tpu.memory_space<vmem>>, vector<1x1xf32>
      tpu.vector_store %arg6[%c0_37, %c0_38], %54 {strides = array<i32>} : memref<1x1xf32, #tpu.memory_space<vmem>>, vector<1x1xf32>,
      %56 = tpu.iota {dimensions = array<i32: 0>} : vector<128x128xi32>
      %57 = tpu.iota {dimensions = array<i32: 1>} : vector<128x128xi32>
      %58 = arith.cmpi sle, %56, %57 : vector<128x128xi32>
      %59 = arith.extui %58 : vector<128x128xi1> to vector<128x128xi32>
      %60 = arith.sitofp %59 : vector<128x128xi32> to vector<128x128xf32>
      %c0_39 = arith.constant 0 : index
      %c0_40 = arith.constant 0 : index
      %61 = vector.load %arg7[%c0_39, %c0_40] : memref<128x128xf32, #tpu.memory_space<vmem>>, vector<128x128xf32>
      tpu.vector_store %arg7[%c0_39, %c0_40], %60 {strides = array<i32>} : memref<128x128xf32, #tpu.memory_space<vmem>>, vector<128x128xf32>,
      %62 = tpu.iota {dimensions = array<i32: 0>} : vector<8x8xi32>
      %63 = tpu.iota {dimensions = array<i32: 1>} : vector<8x8xi32>
      %64 = arith.cmpi slt, %63, %62 : vector<8x8xi32>
      %65 = arith.extui %64 : vector<8x8xi1> to vector<8x8xi32>
      %66 = arith.sitofp %65 : vector<8x8xi32> to vector<8x8xf32>
      %c0_41 = arith.constant 0 : index
      %c0_42 = arith.constant 0 : index
      %67 = vector.load %arg8[%c0_41, %c0_42] : memref<8x8xf32, #tpu.memory_space<vmem>>, vector<8x8xf32>
      tpu.vector_store %arg8[%c0_41, %c0_42], %66 {strides = array<i32>} : memref<8x8xf32, #tpu.memory_space<vmem>>, vector<8x8xf32>,
    } else {
    }
    %c0 = arith.constant 0 : index
    %c0_1 = arith.constant 0 : index
    %3 = vector.load %arg1[%c0, %c0_1] : memref<8x128xf32, #tpu.memory_space<vmem>>, vector<8x128xf32>
    %c0_2 = arith.constant 0 : index
    %c0_3 = arith.constant 0 : index
    %4 = vector.load %arg2[%c0_2, %c0_3] : memref<8x128xf32, #tpu.memory_space<vmem>>, vector<8x128xf32>
    %5 = math.exp %3 : vector<8x128xf32>
    %c0_4 = arith.constant 0 : index
    %c0_5 = arith.constant 0 : index
    %6 = vector.load %arg7[%c0_4, %c0_5] : memref<128x128xf32, #tpu.memory_space<vmem>>, vector<128x128xf32>
    %cst = arith.constant dense<0.000000e+00> : vector<8x128xf32>
    %7 = tpu.matmul %5, %6, %cst {dimension_numbers = #tpu.dot_dimension_numbers<[1], [0], [0], [1], [0, 0, 1, 1], [], []>} : vector<8x128xf32>, vector<128x128xf32>, vector<8x128xf32> -> vector<8x128xf32>
    %cst_6 = arith.constant dense<0.000000e+00> : vector<8xf32>
    %8 = vector.multi_reduction <add>, %5, %cst_6 [1] : vector<8x128xf32> to vector<8xf32>
    %9 = vector.shape_cast %8 : vector<8xf32> to vector<8x1xf32>
    %10 = vector.shape_cast %9 : vector<8x1xf32> to vector<8x1xf32>
    %11 = vector.broadcast %10 : vector<8x1xf32> to vector<8x128xf32>
    %c0_7 = arith.constant 0 : index
    %c0_8 = arith.constant 0 : index
    %12 = vector.load %arg8[%c0_7, %c0_8] : memref<8x8xf32, #tpu.memory_space<vmem>>, vector<8x8xf32>
    %cst_9 = arith.constant dense<0.000000e+00> : vector<8x128xf32>
    %13 = tpu.matmul %12, %11, %cst_9 {dimension_numbers = #tpu.dot_dimension_numbers<[1], [0], [0], [1], [0, 0, 1, 1], [], []>} : vector<8x8xf32>, vector<8x128xf32>, vector<8x128xf32> -> vector<8x128xf32>
    %14 = arith.addf %7, %13 : vector<8x128xf32>
    %c0_10 = arith.constant 0 : index
    %c0_11 = arith.constant 0 : index
    %15 = vector.load %arg4[%c0_10, %c0_11] : memref<1x1xf32, #tpu.memory_space<vmem>>, vector<1x1xf32>
    %16 = vector.broadcast %15 : vector<1x1xf32> to vector<8x128xf32>
    %17 = arith.addf %14, %16 : vector<8x128xf32>
    %cst_12 = arith.constant 1.000000e-07 : f32
    %18 = vector.broadcast %cst_12 : f32 to vector<8x128xf32>
    %19 = arith.addf %17, %18 : vector<8x128xf32>
    %20 = math.log %19 : vector<8x128xf32>
    %21 = arith.subf %3, %20 : vector<8x128xf32>
    %22 = arith.mulf %21, %4 : vector<8x128xf32>
    %c0_13 = arith.constant 0 : index
    %c0_14 = arith.constant 0 : index
    %23 = vector.load %arg5[%c0_13, %c0_14] : memref<1x1xf32, #tpu.memory_space<vmem>>, vector<1x1xf32>
    %24 = vector.shape_cast %22 : vector<8x128xf32> to vector<1x8x128xf32>
    %cst_15 = arith.constant dense<0.000000e+00> : vector<1xf32>
    %25 = vector.multi_reduction <add>, %24, %cst_15 [1, 2] : vector<1x8x128xf32> to vector<1xf32>
    %26 = vector.shape_cast %25 : vector<1xf32> to vector<1x1x1xf32>
    %27 = vector.extract %26[0, 0, 0] : f32 from vector<1x1x1xf32>
    %28 = vector.broadcast %27 : f32 to vector<1x1xf32>
    %29 = arith.addf %23, %28 : vector<1x1xf32>
    %c0_16 = arith.constant 0 : index
    %c0_17 = arith.constant 0 : index
    %30 = vector.load %arg5[%c0_16, %c0_17] : memref<1x1xf32, #tpu.memory_space<vmem>>, vector<1x1xf32>
    tpu.vector_store %arg5[%c0_16, %c0_17], %29 {strides = array<i32>} : memref<1x1xf32, #tpu.memory_space<vmem>>, vector<1x1xf32>,
    %c0_18 = arith.constant 0 : index
    %c0_19 = arith.constant 0 : index
    %31 = vector.load %arg6[%c0_18, %c0_19] : memref<1x1xf32, #tpu.memory_space<vmem>>, vector<1x1xf32>
    %32 = vector.shape_cast %4 : vector<8x128xf32> to vector<1x8x128xf32>
    %cst_20 = arith.constant dense<0.000000e+00> : vector<1xf32>
    %33 = vector.multi_reduction <add>, %32, %cst_20 [1, 2] : vector<1x8x128xf32> to vector<1xf32>
    %34 = vector.shape_cast %33 : vector<1xf32> to vector<1x1x1xf32>
    %35 = vector.extract %34[0, 0, 0] : f32 from vector<1x1x1xf32>
    %36 = vector.broadcast %35 : f32 to vector<1x1xf32>
    %37 = arith.addf %31, %36 : vector<1x1xf32>
    %c0_21 = arith.constant 0 : index
    %c0_22 = arith.constant 0 : index
    %38 = vector.load %arg6[%c0_21, %c0_22] : memref<1x1xf32, #tpu.memory_space<vmem>>, vector<1x1xf32>
    tpu.vector_store %arg6[%c0_21, %c0_22], %37 {strides = array<i32>} : memref<1x1xf32, #tpu.memory_space<vmem>>, vector<1x1xf32>,
    %c0_23 = arith.constant 0 : index
    %c0_24 = arith.constant 0 : index
    %39 = vector.load %arg4[%c0_23, %c0_24] : memref<1x1xf32, #tpu.memory_space<vmem>>, vector<1x1xf32>
    %40 = vector.shape_cast %5 : vector<8x128xf32> to vector<1x8x128xf32>
    %cst_25 = arith.constant dense<0.000000e+00> : vector<1xf32>
    %41 = vector.multi_reduction <add>, %40, %cst_25 [1, 2] : vector<1x8x128xf32> to vector<1xf32>
    %42 = vector.shape_cast %41 : vector<1xf32> to vector<1x1x1xf32>
    %43 = vector.extract %42[0, 0, 0] : f32 from vector<1x1x1xf32>
    %44 = vector.broadcast %43 : f32 to vector<1x1xf32>
    %45 = arith.addf %39, %44 : vector<1x1xf32>
    %c0_26 = arith.constant 0 : index
    %c0_27 = arith.constant 0 : index
    %46 = vector.load %arg4[%c0_26, %c0_27] : memref<1x1xf32, #tpu.memory_space<vmem>>, vector<1x1xf32>
    tpu.vector_store %arg4[%c0_26, %c0_27], %45 {strides = array<i32>} : memref<1x1xf32, #tpu.memory_space<vmem>>, vector<1x1xf32>,
    %c0_i32_28 = arith.constant 0 : i32
    %47 = arith.cmpi eq, %arg0, %c0_i32_28 : i32
    %48 = arith.extui %47 : i1 to i32
    %c0_i32_29 = arith.constant 0 : i32
    %49 = arith.cmpi ne, %48, %c0_i32_29 : i32
    scf.if %49 {
      %c0_30 = arith.constant 0 : index
      %c0_31 = arith.constant 0 : index
      %50 = vector.load %arg5[%c0_30, %c0_31] : memref<1x1xf32, #tpu.memory_space<vmem>>, vector<1x1xf32>
      %cst_32 = arith.constant 0.000000e+00 : f32
      %51 = vector.broadcast %cst_32 : f32 to vector<1x1xf32>
      %52 = arith.subf %51, %50 : vector<1x1xf32>
      %c0_33 = arith.constant 0 : index
      %c0_34 = arith.constant 0 : index
      %53 = vector.load %arg6[%c0_33, %c0_34] : memref<1x1xf32, #tpu.memory_space<vmem>>, vector<1x1xf32>
      %cst_35 = arith.constant 1.000000e-07 : f32
      %54 = vector.broadcast %cst_35 : f32 to vector<1x1xf32>
      %55 = arith.addf %53, %54 : vector<1x1xf32>
      %56 = arith.divf %52, %55 : vector<1x1xf32>
      %c0_36 = arith.constant 0 : index
      %c0_37 = arith.constant 0 : index
      %57 = vector.load %arg3[%c0_36, %c0_37] : memref<1x1xf32, #tpu.memory_space<vmem>>, vector<1x1xf32>
      tpu.vector_store %arg3[%c0_36, %c0_37], %56 {strides = array<i32>} : memref<1x1xf32, #tpu.memory_space<vmem>>, vector<1x1xf32>,
    } else {
    }
    return
  }
  func.func @transform_0(%arg0: i32) -> (i32, i32) {
    %c0_i32 = arith.constant 0 : i32
    %c0_i32_0 = arith.constant 0 : i32
    return %arg0, %c0_i32 : i32, i32
  }
  func.func @transform_1(%arg0: i32) -> (i32, i32) {
    %c0_i32 = arith.constant 0 : i32
    %c0_i32_0 = arith.constant 0 : i32
    return %arg0, %c0_i32 : i32, i32
  }
  func.func @transform_2(%arg0: i32) -> (i32, i32) {
    %c0_i32 = arith.constant 0 : i32
    %c0_i32_0 = arith.constant 0 : i32
    %c0_i32_1 = arith.constant 0 : i32
    return %c0_i32, %c0_i32_0 : i32, i32
  }
}

</mosaic_0001>

<bundles_post_ra>
// kernel: tpu_custom_call.1
= control target key start
LH: loop header
LB: loop body
LE: loop exit
PB: predicated region body
PF: predicated region fallthrough
CT: control target
= control target key end

     0   :  { %7 = vsyncpa [#allocation8], 0  ;;  %s708_s0 = inlined_call_operand.hbm [shape: f32[8,128], index: 0, kind: input, shape index: {}]   ;;  %s709_s1 = inlined_call_operand.hbm [shape: f32[8,128], index: 1, kind: input, shape index: {}]   ;;  %s710_s2 = inlined_call_operand.hbm [shape: f32[1,1], index: 2, kind: output, shape index: {}]  }
   0x1   :  { %8 = vsyncpa [#allocation11], 0 }
   0x2   :  { %9 = vsyncpa [#allocation9], 0  ;;  %s590_s9 = smov [#allocation7]   ;;  %s591_s11 = smov [#allocation10]  }
   0x3   :  { %s16_s10 = sshll.u32 %s590_s9, 4  ;;  %s26_s12 = sshll.u32 %s591_s11, 4  ;;  %s17_s10 = int_to_ptr.vmem [resolvable:$true] %s16_s10  ;;  %s27_s12 = int_to_ptr.vmem [resolvable:$true] %s26_s12 }
   0x4   :  { %s518_s15 = scalar_lea.hbm %s708_s0, 128 }
   0x5   :  { %p519_p0 = scmp.ne.s32.totalorder %s708_s0, %s518_s15  ;;  %p522_p1 = scmp.lt.u32.totalorder %s518_s15, %s708_s0 }
   0x7   :  { %p524_p2 = pnand %p522_p1, %p519_p0 }
   0x9   :  { %527 = shalt.err (!%p524_p2)
}
   0xa   :  { %s528_s20 = scalar_lea.vmem %s17_s10, 128  ;;  %p533_p4 = scmp.lt.s32.totalorder %s17_s10, %s17_s10 }
   0xb   :  { %p529_p3 = scmp.ne.s32.totalorder %s17_s10, %s528_s20  ;;  %p534_p5 = scmp.lt.s32.totalorder %s528_s20, %s528_s20 }
   0xd   :  { %p535_p6 = por %p534_p5, %p533_p4 }
   0xf   :  { %p536_p7 = pnand %p535_p6, %p529_p3 }
  0x11   :  { %539 = shalt.err (!%p536_p7)
}
  0x12   :  { %19 = dma.hbm_to_vmem [thread:$0]  %s708_s0, 128, %s17_s10, [#allocation8]  }
  0x13   :  { %s540_s25 = scalar_lea.hbm %s709_s1, 128 }
  0x14   :  { %p541_p8 = scmp.ne.s32.totalorder %s709_s1, %s540_s25  ;;  %p544_p9 = scmp.lt.u32.totalorder %s540_s25, %s709_s1 }
  0x16   :  { %p546_p10 = pnand %p544_p9, %p541_p8 }
  0x18   :  { %549 = shalt.err (!%p546_p10)
}
  0x19   :  { %s550_s30 = scalar_lea.vmem %s27_s12, 128  ;;  %p555_p12 = scmp.lt.s32.totalorder %s27_s12, %s27_s12 }
  0x1a   :  { %p551_p11 = scmp.ne.s32.totalorder %s27_s12, %s550_s30  ;;  %p556_p13 = scmp.lt.s32.totalorder %s550_s30, %s550_s30 }
  0x1c   :  { %p557_p0 = por %p556_p13, %p555_p12 }
  0x1e   :  { %p558_p1 = pnand %p557_p0, %p551_p11 }
  0x20   :  { %561 = shalt.err (!%p558_p1)
}
  0x21   :  { %29 = dma.hbm_to_vmem [thread:$0]  %s709_s1, 128, %s27_s12, [#allocation11]  }
  0x22   :  { %584 = dma.done.wait [#allocation8], 128  }
  0x23   :  { %585 = vsyncadd [#allocation8], 4294967168 }
  0x24   :  { %586 = dma.done.wait [#allocation11], 128  }
  0x25   :  { %587 = vsyncadd [#allocation11], 4294967168  ;;  %v44_v0 = vlaneseq  ;;  %vm40_vm0 = vcmask 0   ;;  %v592_v1 = vmov 0.0|0.0   ;;  %v593_v4 = vmov 0.0   ;;  %v655_v10 = vld [vmem:[#allocation7] sm:$0xff] }
  0x26   :  { %473 = vmatprep.subr.bf16.mxu1 %v592_v1  ;;  %41 = vst.msk [vmem:[#allocation2] sm:$0x1] %vm40_vm0, %v593_v4  ;;  %433 = vmatprep.subr.mxu0 %v593_v4  ;;  %42 = vst.msk [vmem:[#allocation3] sm:$0x1] %vm40_vm0, %v593_v4  ;;  %vm594_vm1 = vmmov 0   ;;  %v596_v25 = vmov 0  }
  0x27   :  { %v638_v2 = vshrl.u32 %v44_v0, 7  ;;  %v640_v3 = vand.u32 127, %v44_v0  ;;  %43 = vst.msk [vmem:[#allocation4] sm:$0x1] %vm40_vm0, %v593_v4  ;;  %470 = vmatprep.mubr.msk.f32.mxu1 %vm594_vm1, %v593_v4  ;;  %435 = vmatprep.mubr.msk.f32.mxu0 %vm594_vm1, %v593_v4  ;;  %v134_v11 = vmul.f32 1.442695, %v655_v10 }
  0x28   :  { %v595_v12 = vmov 1.0|1.0   ;;  %511 = vset.pattern.permute.xlu0 %v596_v25  ;;  %v133_v39 = vld [vmem:[#allocation10] sm:$0xff]  ;;  %s597_s6 = smov [#allocation12]  }
  0x29   :  { %v46_v5 = vadd.s32 8, %v638_v2  ;;  %vm63_vm2 = vcmp.le.s32.totalorder %v638_v2, %v640_v3  ;;  %v47_v6 = vadd.s32 16, %v638_v2  ;;  %v48_v7 = vadd.s32 24, %v638_v2  ;;  %s369_s7 = sshll.u32 %s597_s6, 4  ;;  %s370_s7 = int_to_ptr.vmem [resolvable:$true] %s369_s7 }
  0x2a   :  { %v49_v8 = vadd.s32 32, %v638_v2  ;;  %v50_v9 = vadd.s32 40, %v638_v2  ;;  %v51_v13 = vadd.s32 48, %v638_v2  ;;  %512 = vpow2.f32 %v134_v11  ;;  %s562_s8 = scalar_lea.vmem %s370_s7, 16  ;;  %s566_s9 = scalar_lea.vmem %s370_s7, 32 }
  0x2b   :  { %vm64_vm3 = vcmp.le.s32.totalorder %v46_v5, %v640_v3  ;;  %vm65_vm4 = vcmp.le.s32.totalorder %v47_v6, %v640_v3  ;;  %vm66_vm5 = vcmp.le.s32.totalorder %v48_v7, %v640_v3  ;;  %v52_v14 = vadd.s32 56, %v638_v2  ;;  %p563_p2 = scmp.ne.s32.totalorder %s370_s7, %s562_s8  ;;  %p567_p3 = scmp.lt.s32.totalorder %s370_s7, %s370_s7 }
  0x2c   :  { %vm474_vm6 = vmpackc.low %vm64_vm3, %vm63_vm2  ;;  %vm67_vm8 = vcmp.le.s32.totalorder %v49_v8, %v640_v3  ;;  %vm68_vm9 = vcmp.le.s32.totalorder %v50_v9, %v640_v3  ;;  %vm69_vm11 = vcmp.le.s32.totalorder %v51_v13, %v640_v3  ;;  %v53_v15 = vadd.s32 64, %v638_v2  ;;  %p568_p4 = scmp.lt.s32.totalorder %s566_s9, %s562_s8 }
  0x2d   :  { %475 = vmatpush3.bf16.msk.msra.mxu1 %vm474_vm6, %v595_v12  ;;  %vm477_vm7 = vmpackc.low %vm66_vm5, %vm65_vm4  ;;  %vm70_vm12 = vcmp.le.s32.totalorder %v52_v14, %v640_v3  ;;  %v54_v16 = vadd.s32 72, %v638_v2  ;;  %v55_v17 = vadd.s32 80, %v638_v2  ;;  %v56_v18 = vadd.s32 88, %v638_v2  ;;  %v397_v26 = vld [vmem:[#allocation2] ss:$0 sm:$0xff] }
  0x2e   :  { %476 = vmatprep.subr.bf16.mxu1 %v592_v1  ;;  %vm480_vm10 = vmpackc.low %vm68_vm9, %vm67_vm8  ;;  %vm71_vm14 = vcmp.le.s32.totalorder %v53_v15, %v640_v3  ;;  %v57_v20 = vadd.s32 96, %v638_v2  ;;  %v58_v21 = vadd.s32 104, %v638_v2  ;;  %v59_v22 = vadd.s32 112, %v638_v2  ;;  %v315_v62 = vld [vmem:[#allocation3] sm:$0x1]  ;;  %p569_p5 = por %p568_p4, %p567_p3 }
  0x2f   :  { %vm483_vm13 = vmpackc.low %vm70_vm12, %vm69_vm11  ;;  %vm72_vm15 = vcmp.le.s32.totalorder %v54_v16, %v640_v3  ;;  %vm73_vm2 = vcmp.le.s32.totalorder %v55_v17, %v640_v3  ;;  %vm74_vm3 = vcmp.le.s32.totalorder %v56_v18, %v640_v3  ;;  %v60_v23 = vadd.s32 120, %v638_v2 }
  0x30   :  { %vm486_vm1 = vmpackc.low %vm72_vm15, %vm71_vm14  ;;  %vm75_vm5 = vcmp.le.s32.totalorder %v57_v20, %v640_v3  ;;  %vm76_vm6 = vcmp.le.s32.totalorder %v58_v21, %v640_v3  ;;  %vm130_vm8 = vcmask 64512   ;;  %p570_p6 = pnand %p569_p5, %p563_p2 }
  0x31   :  { %478 = vmatpush3.bf16.msk.msra.mxu1 %vm477_vm7, %v595_v12  ;;  %vm489_vm4 = vmpackc.low %vm74_vm3, %vm73_vm2  ;;  %vm127_vm7 = vcmp.lt.s32.totalorder %v640_v3, %v638_v2  ;;  %vm78_vm11 = vcmp.le.s32.totalorder %v60_v23, %v640_v3  ;;  %v342_v2 = vld [vmem:[#allocation2] sm:$0x1] }
  0x32   :  { %479 = vmatprep.subr.bf16.mxu1 %v592_v1  ;;  %v395_v24 = vsel %vm127_vm7, 1.0, %v593_v4  ;;  %vm492_vm9 = vmpackc.low %vm76_vm6, %vm75_vm5 }
  0x33   :  { %131 = vst.msk [vmem:[#allocation6] sm:$0xff] %vm130_vm8, %v395_v24 }
  0x34   :  { %v513_v19 = vpop.eup %512 }
  0x35   :  { %481 = vmatpush3.bf16.msk.msra.mxu1 %vm480_vm10, %v595_v12  ;;  %152 = vadd.xlane.f32.xlu0 %v513_v19  ;;  %vm77_vm10 = vcmp.le.s32.totalorder %v59_v22, %v640_v3 }
  0x36   :  { %482 = vmatprep.subr.bf16.mxu1 %v592_v1  ;;  %vm495_vm12 = vmpackc.low %vm78_vm11, %vm77_vm10 }
  0x39   :  { %484 = vmatpush3.bf16.msk.msra.mxu1 %vm483_vm13, %v595_v12 }
  0x3a   :  { %485 = vmatprep.subr.bf16.mxu1 %v592_v1  ;;  %v154_v27 = vld [vmem:[#allocation6] sm:$0xff] }
  0x3d   :  { %487 = vmatpush3.bf16.msk.msra.mxu1 %vm486_vm1, %v595_v12 }
  0x3e   :  { %488 = vmatprep.subr.bf16.mxu1 %v592_v1 }
  0x41   :  { %490 = vmatpush3.bf16.msk.msra.mxu1 %vm489_vm4, %v595_v12 }
  0x42   :  { %491 = vmatprep.subr.bf16.mxu1 %v592_v1 }
  0x45   :  { %493 = vmatpush3.bf16.msk.msra.mxu1 %vm492_vm9, %v595_v12 }
  0x46   :  { %494 = vmatprep.subr.bf16.mxu1 %v592_v1  ;;  %v329_v1 = vld [vmem:[#allocation4] sm:$0x1] }
  0x49   :  { %496 = vmatpush3.bf16.msk.msra.mxu1 %vm495_vm12, %v595_v12 }
  0x4b   :  { %306 = vperm.xlu0 %511, %v397_v26  }
  0x4c   :  { %471 = vmatmul.mubr.f32.vlgmr.msra.gmra.mrb[0].mxu1 %v513_v19 }
  0xc2   :  { %v153_v28 = vpop.xlane.xlu0 %152 }
  0xc3   :  { %434 = vmatpush3.msra.mxu0 %v153_v28  ;;  %v343_v42 = vrot.slane %v153_v28, 4 }
  0xc4   :  { %436 = vmatmul.mubr.msk.f32.vlgmr.msra.gmra.mrb[0].mxu0 %vm130_vm8, %v154_v27 }
  0xc5   :  { %v344_v43 = vadd.f32 %v343_v42, %v153_v28 }
  0xc7   :  { %v345_v48 = vrot.slane %v344_v43, 2 }
  0xc9   :  { %v346_v53 = vadd.f32 %v345_v48, %v344_v43 }
  0xca   :  { %v307_v32 = vpop.permute.xlu0 %306 }
  0xcb   :  { %v347_v58 = vrot.slane %v346_v53, 1 }
  0xcd   :  { %v348_v61 = vadd.f32 %v347_v58, %v346_v53 }
 0x11f   :  { %v295_v29 = vpop.f32.mrb[0].mxu1 }
 0x120   :  { %v472_v30 = vpop.f32.mrb[1].mxu1 }
 0x197   :  { %v225_v31 = vpop.f32.mrb[0].mxu0 }
 0x198   :  { %v296_v33 = vadd.f32 %v295_v29, %v225_v31  ;;  %v437_v34 = vpop.f32.mrb[1].mxu0 }
 0x19a   :  { %v309_v35 = vadd.f32 %v307_v32, %v296_v33 }
 0x19c   :  { %v310_v36 = vadd.f32 1e-07, %v309_v35 }
 0x19e   :  { %514 = vlog2.f32 %v310_v36 }
 0x1a8   :  { %v515_v37 = vpop.eup %514 }
 0x1a9   :  { %v312_v38 = vmul.f32 0.6931472, %v515_v37 }
 0x1ab   :  { %v313_v40 = vsub.f32 %v655_v10, %v312_v38 }
 0x1ad   :  { %v314_v41 = vmul.f32 %v313_v40, %v133_v39 }
 0x1af   :  { %316 = vadd.xlane.f32.xlu1 %v314_v41 }
 0x1b3   :  { %330 = vadd.xlane.f32.xlu1 %v133_v39 }
 0x23c   :  { %v317_v44 = vpop.xlane.xlu1 %316 }
 0x23d   :  { %v318_v45 = vrot.slane %v317_v44, 4 }
 0x23f   :  { %v319_v46 = vadd.f32 %v318_v45, %v317_v44 }
 0x240   :  { %v331_v47 = vpop.xlane.xlu1 %330 }
 0x241   :  { %v320_v49 = vrot.slane %v319_v46, 2  ;;  %v332_v50 = vrot.slane %v331_v47, 4 }
 0x243   :  { %v333_v51 = vadd.f32 %v332_v50, %v331_v47  ;;  %v321_v52 = vadd.f32 %v320_v49, %v319_v46 }
 0x245   :  { %v334_v54 = vrot.slane %v333_v51, 2  ;;  %v322_v55 = vrot.slane %v321_v52, 1 }
 0x247   :  { %v335_v56 = vadd.f32 %v334_v54, %v333_v51  ;;  %v323_v57 = vadd.f32 %v322_v55, %v321_v52 }
 0x249   :  { %497 = vpush %v323_v57  ;;  %v336_v59 = vrot.slane %v335_v56, 1 }
 0x24b   :  { %v337_v60 = vadd.f32 %v336_v59, %v335_v56 }
 0x24d   :  { %499 = vpush %v337_v60 }
 0x24e   :  { %501 = vpush %v348_v61 }
 0x27a   :  { %s498_s1 = spop %497 }
 0x27b   :  { %v325_v63 = vstv %s498_s1 }
 0x27c   :  { %v326_v0 = vadd.f32 %v325_v63, %v315_v62 }
 0x27e   :  { %328 = vst.msk [vmem:[#allocation3] sm:$0x1] %vm40_vm0, %v326_v0  ;;  %s500_s4 = spop %499 }
 0x27f   :  { %v339_v3 = vstv %s500_s4  ;;  %s502_s5 = spop %501 }
 0x280   :  { %v340_v4 = vadd.f32 %v339_v3, %v329_v1  ;;  %v350_v5 = vstv %s502_s5 }
 0x281   :  { %v351_v6 = vadd.f32 %v350_v5, %v342_v2 }
 0x282   :  { %341 = vst.msk [vmem:[#allocation4] sm:$0x1] %vm40_vm0, %v340_v4 }
 0x283   :  { %352 = vst.msk [vmem:[#allocation2] sm:$0x1] %vm40_vm0, %v351_v6 }
 0x285   :  { %v356_v9 = vld [vmem:[#allocation3] sm:$0x1] }
 0x286   :  { %v357_v10 = vsub.f32 0.0, %v356_v9 }
 0x289   :  { %v358_v7 = vld [vmem:[#allocation4] sm:$0x1] }
 0x28a   :  { %v359_v8 = vadd.f32 1e-07, %v358_v7 }
 0x28c   :  { %516 = vrcp.f32 %v359_v8 }
 0x296   :  { %v517_v11 = vpop.eup %516 }
 0x297   :  { %v361_v12 = vmul.f32 %v517_v11, %v357_v10 }
 0x299   :  { %362 = vst.msk [vmem:[#allocation12] sm:$0x1] %vm40_vm0, %v361_v12 }
 0x29a   :  { %573 = shalt.err (!%p570_p6)
}
 0x29b   :  { %s574_s12 = scalar_lea.hbm %s710_s2, 16 }
 0x29c   :  { %p575_p7 = scmp.ne.s32.totalorder %s710_s2, %s574_s12  ;;  %p578_p8 = scmp.lt.u32.totalorder %s574_s12, %s710_s2 }
 0x29e   :  { %p580_p9 = pnand %p578_p8, %p575_p7 }
 0x2a0   :  { %583 = shalt.err (!%p580_p9)
}
 0x2a1   :  { %372 = dma.vmem_to_hbm [thread:$0]  %s370_s7, 16, %s710_s2, [#allocation9]  }
 0x2a2   :  { %588 = dma.done.wait [#allocation9], 16  }
 0x2a3   :  { %589 = vsyncadd [#allocation9], 4294967280 }
 0x2a4   :  { %376 = vsyncpa [#allocation8], 1 }
 0x2a5   :  { %377 = vsyncpa [#allocation11], 1 }
 0x2a6   :  { %378 = vsyncpa [#allocation9], 1 }

</bundles_post_ra>
